<compile_context>
chip_gen: v7x
topology: tpu7x:2x2x1
jax: 0.10.0
libtpu: 0.0.40
codegen_flags: <defaults>
</compile_context>

<pallas_src>
import functools
import math

import jax
import jax.numpy as jnp
from jax.experimental import pallas as pl
from jax.experimental.pallas import tpu as pltpu


# ---------------------------------------------------------------------------
# Kernel
# ---------------------------------------------------------------------------
def _transpose_kernel(perm, x_ref, o_ref):
    # Reorder the axes of the resident VMEM block (typically a batched
    # last-two-dims swap after coalescing -> XLU transpose).
    o_ref[...] = jnp.transpose(x_ref[...], perm)


# ---------------------------------------------------------------------------
# Helpers
# ---------------------------------------------------------------------------
def _coalesce(shape, dims):
    """Drop size-1 axes and merge axes that stay adjacent & in-order.

    Returns (reduced_input_shape, reduced_perm).  reduced_perm == identity iff
    the original permute is a pure (free) reshape.
    """
    n = len(shape)
    keep = [a for a in range(n) if shape[a] != 1]
    if not keep:
        return (), ()
    out_order = [a for a in dims if shape[a] != 1]      # input axes, output order
    pos_in_out = {a: i for i, a in enumerate(out_order)}

    groups = [[keep[0]]]
    for a in keep[1:]:
        prev = groups[-1][-1]
        # `a` directly follows `prev` in memory (only size-1 axes in between)
        # and directly follows it in the output ordering -> merge.
        if pos_in_out[a] == pos_in_out[prev] + 1:
            groups[-1].append(a)
        else:
            groups.append([a])

    red_in_shape = tuple(math.prod(shape[a] for a in g) for g in groups)
    group_of = {a: gi for gi, g in enumerate(groups) for a in g}
    red_perm, seen = [], set()
    for a in out_order:
        gi = group_of[a]
        if gi not in seen:
            seen.add(gi)
            red_perm.append(gi)
    return red_in_shape, tuple(red_perm)


def _allowed_block_sizes(extent, need8, need128):
    """Divisors of `extent` usable as a block size under the (8,128) rule."""
    out = []
    for d in range(1, extent + 1):
        if extent % d:
            continue
        if d == extent:                 # full extent is always legal
            out.append(d)
            continue
        if need128 and d % 128:
            continue
        if need8 and d % 8:
            continue
        out.append(d)
    return out


# ---------------------------------------------------------------------------
# Pallas permute
# ---------------------------------------------------------------------------
def permute(x, dims, *, target_block_bytes=2 * 1024 * 1024):
    """Pallas implementation of PermuteLayer.forward: jnp.transpose(x, dims)."""
    n = x.ndim
    if n == 0:
        return x
    dims = tuple(int(d) % n for d in dims)
    if sorted(dims) != list(range(n)):
        raise ValueError(f"dims={dims} is not a permutation of rank {n}")

    out_shape = tuple(x.shape[d] for d in dims)

    # ---- Fast paths: permutation moves no data in memory --------------------
    if n <= 1 or dims == tuple(range(n)):
        return x
    if x.size == 0:
        return x.reshape(out_shape)
    red_in_shape, p = _coalesce(x.shape, dims)
    m = len(red_in_shape)
    if m <= 1 or p == tuple(range(m)):
        return x.reshape(out_shape)          # metadata-only reshape, no kernel

    red_out_shape = tuple(red_in_shape[a] for a in p)
    inv = [0] * m
    for k, a in enumerate(p):
        inv[a] = k

    itemsize = jnp.dtype(x.dtype).itemsize
    budget_elems = max(1, target_block_bytes // itemsize)

    # ---- Per-output-axis block-size constraints ------------------------------
    # An output axis k is constrained by its own position (output block minor
    # dims) AND by the position of its source input axis p[k] (input block
    # minor dims), since in_block is the permuted out_block.
    allowed, prio = [], []
    for k in range(m):
        a = p[k]
        need128 = (k == m - 1) or (a == m - 1)
        need8 = (k == m - 2) or (a == m - 2)
        allowed.append(_allowed_block_sizes(red_out_shape[k], need8, need128))
        prio.append(0 if not (need8 or need128) else (1 if not need128 else 2))

    # ---- Choose block: start full, halve until ~target_block_bytes/operand ---
    # Shrink leading (unconstrained) axes first, then the largest constrained
    # axis -> big, lane-dense, roughly square transpose tiles.
    block = list(red_out_shape)
    while math.prod(block) > budget_elems:
        shrinkable = [k for k in range(m) if any(d < block[k] for d in allowed[k])]
        if not shrinkable:
            break
        k = min(shrinkable, key=lambda kk: (prio[kk], -block[kk]))
        cand = [d for d in allowed[k] if d < block[k]]
        half = block[k] // 2
        le = [d for d in cand if d <= half]
        block[k] = max(le) if le else max(cand)
    block = tuple(block)
    in_block = tuple(block[inv[a]] for a in range(m))

    # ---- Grid over every blocked output axis ---------------------------------
    grid_axes = [k for k in range(m) if block[k] < red_out_shape[k]]
    if grid_axes:
        grid = tuple(red_out_shape[k] // block[k] for k in grid_axes)
        pos = {k: i for i, k in enumerate(grid_axes)}

        def out_index_map(*g):
            return tuple(g[pos[k]] if k in pos else 0 for k in range(m))

        def in_index_map(*g):
            return tuple(
                g[pos[inv[a]]] if inv[a] in pos else 0 for a in range(m))
    else:
        grid = (1,)

        def out_index_map(_):
            return (0,) * m

        def in_index_map(_):
            return (0,) * m

    kernel = functools.partial(_transpose_kernel, p)

    # ---- VMEM budget (double-buffered in + out) -------------------------------
    step_bytes = 2 * 2 * itemsize * math.prod(block)
    compiler_kwargs = dict(dimension_semantics=("parallel",) * len(grid))
    if step_bytes > (12 << 20):
        # Minor dims too large AND not 8/128-tileable: raise scoped VMEM.
        # TODO(synk): pad-and-tile unaligned minor dims instead of relying on a
        # bigger VMEM window when step_bytes approaches physical VMEM (v7x: 64 MiB).
        compiler_kwargs["vmem_limit_bytes"] = int(
            min(step_bytes + (4 << 20), 48 << 20))

    out_red = pl.pallas_call(
        kernel,
        out_shape=jax.ShapeDtypeStruct(red_out_shape, x.dtype),
        grid_spec=pltpu.PrefetchScalarGridSpec(
            num_scalar_prefetch=0,
            grid=grid,
            in_specs=[pl.BlockSpec(in_block, in_index_map)],
            out_specs=pl.BlockSpec(block, out_index_map),
        ),
        compiler_params=pltpu.CompilerParams(**compiler_kwargs),
    )(x.reshape(red_in_shape))

    return out_red.reshape(out_shape)


class PermuteLayer:
    """Pallas port of the PyTorch PermuteLayer."""

    def __init__(self, dims):
        self.dims = tuple(int(d) for d in dims)
        self._forward = jax.jit(functools.partial(permute, dims=self.dims))

    def __call__(self, inputs):
        return self._forward(inputs)


if __name__ == "__main__":
    key = jax.random.PRNGKey(0)
    # NCHW-style input: batch=2, channels=4, 16x16 spatial.
    x = jax.random.normal(key, (2, 4, 16, 16), dtype=jnp.float32)

    test_dims = [
        (0, 2, 3, 1),   # NCHW -> NHWC  (coalesces to batched last-two swap)
        (0, 1, 3, 2),   # swap H and W
        (2, 3, 0, 1),   # spatial dims to front (coalesces to a 2-D transpose)
        (0, 1, 2, 3),   # identity (kernel bypass)
    ]
    for dims in test_dims:
        layer = PermuteLayer(dims)
        y = jax.block_until_ready(layer(x))
        y_ref = jnp.transpose(x, dims)
        assert y.shape == y_ref.shape, (dims, y.shape, y_ref.shape)
        assert y.dtype == x.dtype, (dims, y.dtype, x.dtype)
        assert bool(jnp.array_equal(y, y_ref)), f"permute mismatch for dims={dims}"

    # Exercise the tiled / gridded path (128-aligned minor blocks, grid > 1).
    x2 = jax.random.normal(key, (4, 128, 8, 128), dtype=jnp.float32)
    dims2 = (0, 2, 3, 1)
    y2 = jax.block_until_ready(
        permute(x2, dims2, target_block_bytes=256 * 1024))
    y2_ref = jnp.transpose(x2, dims2)
    assert y2.shape == y2_ref.shape
    assert bool(jnp.array_equal(y2, y2_ref)), "tiled permute mismatch"

    print("KERNEL_OK")
</pallas_src>

<mosaic_0001>
module attributes {stable_mosaic.version = 11 : i64} {
  func.func @_transpose_kernel(%arg0: i32, %arg1: memref<2x4x256xf32, #tpu.memory_space<vmem>>, %arg2: memref<2x256x4xf32, #tpu.memory_space<vmem>>) attributes {dimension_semantics = [#tpu.dimension_semantics<parallel>], iteration_bounds = array<i64: 1>, scalar_prefetch = 0 : i64, scratch_operands = 0 : i64, tpu.core_type = #tpu.core_type<tc>, window_params = [{pipeline_mode = #tpu.pipeline_mode<synchronous>, transform_indices = @transform_0, window_bounds = array<i64: 2, 4, 256>}, {pipeline_mode = #tpu.pipeline_mode<synchronous>, transform_indices = @transform_1, window_bounds = array<i64: 2, 256, 4>}]} {
    %c0 = arith.constant 0 : index
    %c0_0 = arith.constant 0 : index
    %c0_1 = arith.constant 0 : index
    %0 = vector.load %arg1[%c0, %c0_0, %c0_1] : memref<2x4x256xf32, #tpu.memory_space<vmem>>, vector<2x4x256xf32>
    %1 = tpu.transpose %0, [0, 2, 1] : vector<2x4x256xf32> -> vector<2x256x4xf32>
    %c0_2 = arith.constant 0 : index
    %c0_3 = arith.constant 0 : index
    %c0_4 = arith.constant 0 : index
    %2 = vector.load %arg2[%c0_2, %c0_3, %c0_4] : memref<2x256x4xf32, #tpu.memory_space<vmem>>, vector<2x256x4xf32>
    tpu.vector_store %arg2[%c0_2, %c0_3, %c0_4], %1 {strides = array<i32>} : memref<2x256x4xf32, #tpu.memory_space<vmem>>, vector<2x256x4xf32>,
    return
  }
  func.func @transform_0(%arg0: i32) -> (i32, i32, i32) {
    %c0_i32 = arith.constant 0 : i32
    %c0_i32_0 = arith.constant 0 : i32
    %c0_i32_1 = arith.constant 0 : i32
    %c0_i32_2 = arith.constant 0 : i32
    return %c0_i32, %c0_i32_0, %c0_i32_1 : i32, i32, i32
  }
  func.func @transform_1(%arg0: i32) -> (i32, i32, i32) {
    %c0_i32 = arith.constant 0 : i32
    %c0_i32_0 = arith.constant 0 : i32
    %c0_i32_1 = arith.constant 0 : i32
    %c0_i32_2 = arith.constant 0 : i32
    return %c0_i32, %c0_i32_0, %c0_i32_1 : i32, i32, i32
  }
}

</mosaic_0001>

<bundles_post_ra>
// kernel: permute.1
= control target key start
LH: loop header
LB: loop body
LE: loop exit
PB: predicated region body
PF: predicated region fallthrough
CT: control target
= control target key end

     0   :  { %vm144_vm0 = vcmask 31744   ;;  %s488_s0 = inlined_call_operand.vmem [shape: f32[2,4,256], index: 0, kind: input, shape index: {}]   ;;  %s489_s1 = inlined_call_operand.vmem [shape: f32[2,256,4], index: 1, kind: output, shape index: {}]  }
   0x1   :  { %v9_v0 = vld [vmem:[%s488_s0 + $0x8] sm:$0xff]  ;;  %v8_v1 = vld [vmem:[%s488_s0] sm:$0xff] }
   0x2   :  { %80 = vxpose.xlu1.b32.start.end [1/1] (short) %v9_v0, 128  ;;  %16 = vxpose.xlu0.b32.start.end [1/1] (short) %v8_v1, 128  ;;  %v13_v2 = vcombine.high %v9_v0, %v9_v0  ;;  %v12_v3 = vcombine.high %v8_v1, %v8_v1 }
  0x3f   :  { %112 = vxpose.xlu1.b32.start.end [1/1] (short) %v13_v2, 128  ;;  %48 = vxpose.xlu0.b32.start.end [1/1] (short) %v12_v3, 128 }
  0x82   :  { %v96_v4 = vpop.trf.xlu1  ;;  %v32_v5 = vpop.trf.xlu0 }
  0x83   :  { %177 = vst.msk [vmem:[%s489_s1 + $0x100] sm:$0xff] %vm144_vm0, %v96_v4  ;;  %145 = vst.msk [vmem:[%s489_s1] sm:$0xff] %vm144_vm0, %v32_v5 }
  0x86   :  { %v97_v6 = vpop.trf.xlu1  ;;  %v33_v7 = vpop.trf.xlu0 }
  0x87   :  { %178 = vst.msk [vmem:[%s489_s1 + $0x108] sm:$0xff] %vm144_vm0, %v97_v6  ;;  %146 = vst.msk [vmem:[%s489_s1 + $0x8] sm:$0xff] %vm144_vm0, %v33_v7 }
  0x8a   :  { %v98_v8 = vpop.trf.xlu1  ;;  %v34_v9 = vpop.trf.xlu0 }
  0x8b   :  { %179 = vst.msk [vmem:[%s489_s1 + $0x110] sm:$0xff] %vm144_vm0, %v98_v8  ;;  %147 = vst.msk [vmem:[%s489_s1 + $0x10] sm:$0xff] %vm144_vm0, %v34_v9 }
  0x8e   :  { %v99_v10 = vpop.trf.xlu1  ;;  %v35_v11 = vpop.trf.xlu0 }
  0x8f   :  { %180 = vst.msk [vmem:[%s489_s1 + $0x118] sm:$0xff] %vm144_vm0, %v99_v10  ;;  %148 = vst.msk [vmem:[%s489_s1 + $0x18] sm:$0xff] %vm144_vm0, %v35_v11 }
  0x92   :  { %v100_v12 = vpop.trf.xlu1  ;;  %v36_v13 = vpop.trf.xlu0 }
  0x93   :  { %181 = vst.msk [vmem:[%s489_s1 + $0x120] sm:$0xff] %vm144_vm0, %v100_v12  ;;  %149 = vst.msk [vmem:[%s489_s1 + $0x20] sm:$0xff] %vm144_vm0, %v36_v13 }
  0x96   :  { %v101_v14 = vpop.trf.xlu1  ;;  %v37_v15 = vpop.trf.xlu0 }
  0x97   :  { %182 = vst.msk [vmem:[%s489_s1 + $0x128] sm:$0xff] %vm144_vm0, %v101_v14  ;;  %150 = vst.msk [vmem:[%s489_s1 + $0x28] sm:$0xff] %vm144_vm0, %v37_v15 }
  0x9a   :  { %v102_v16 = vpop.trf.xlu1  ;;  %v38_v17 = vpop.trf.xlu0 }
  0x9b   :  { %183 = vst.msk [vmem:[%s489_s1 + $0x130] sm:$0xff] %vm144_vm0, %v102_v16  ;;  %151 = vst.msk [vmem:[%s489_s1 + $0x30] sm:$0xff] %vm144_vm0, %v38_v17 }
  0x9e   :  { %v103_v18 = vpop.trf.xlu1  ;;  %v39_v19 = vpop.trf.xlu0 }
  0x9f   :  { %184 = vst.msk [vmem:[%s489_s1 + $0x138] sm:$0xff] %vm144_vm0, %v103_v18  ;;  %152 = vst.msk [vmem:[%s489_s1 + $0x38] sm:$0xff] %vm144_vm0, %v39_v19 }
  0xa2   :  { %v104_v20 = vpop.trf.xlu1  ;;  %v40_v21 = vpop.trf.xlu0 }
  0xa3   :  { %185 = vst.msk [vmem:[%s489_s1 + $0x140] sm:$0xff] %vm144_vm0, %v104_v20  ;;  %153 = vst.msk [vmem:[%s489_s1 + $0x40] sm:$0xff] %vm144_vm0, %v40_v21 }
  0xa6   :  { %v105_v22 = vpop.trf.xlu1  ;;  %v41_v23 = vpop.trf.xlu0 }
  0xa7   :  { %186 = vst.msk [vmem:[%s489_s1 + $0x148] sm:$0xff] %vm144_vm0, %v105_v22  ;;  %154 = vst.msk [vmem:[%s489_s1 + $0x48] sm:$0xff] %vm144_vm0, %v41_v23 }
  0xaa   :  { %v106_v24 = vpop.trf.xlu1  ;;  %v42_v25 = vpop.trf.xlu0 }
  0xab   :  { %187 = vst.msk [vmem:[%s489_s1 + $0x150] sm:$0xff] %vm144_vm0, %v106_v24  ;;  %155 = vst.msk [vmem:[%s489_s1 + $0x50] sm:$0xff] %vm144_vm0, %v42_v25 }
  0xae   :  { %v107_v26 = vpop.trf.xlu1  ;;  %v43_v27 = vpop.trf.xlu0 }
  0xaf   :  { %188 = vst.msk [vmem:[%s489_s1 + $0x158] sm:$0xff] %vm144_vm0, %v107_v26  ;;  %156 = vst.msk [vmem:[%s489_s1 + $0x58] sm:$0xff] %vm144_vm0, %v43_v27 }
  0xb2   :  { %v108_v28 = vpop.trf.xlu1  ;;  %v44_v29 = vpop.trf.xlu0 }
  0xb3   :  { %189 = vst.msk [vmem:[%s489_s1 + $0x160] sm:$0xff] %vm144_vm0, %v108_v28  ;;  %157 = vst.msk [vmem:[%s489_s1 + $0x60] sm:$0xff] %vm144_vm0, %v44_v29 }
  0xb6   :  { %v109_v30 = vpop.trf.xlu1  ;;  %v45_v31 = vpop.trf.xlu0 }
  0xb7   :  { %190 = vst.msk [vmem:[%s489_s1 + $0x168] sm:$0xff] %vm144_vm0, %v109_v30  ;;  %158 = vst.msk [vmem:[%s489_s1 + $0x68] sm:$0xff] %vm144_vm0, %v45_v31 }
  0xba   :  { %v110_v32 = vpop.trf.xlu1  ;;  %v46_v33 = vpop.trf.xlu0 }
  0xbb   :  { %191 = vst.msk [vmem:[%s489_s1 + $0x170] sm:$0xff] %vm144_vm0, %v110_v32  ;;  %159 = vst.msk [vmem:[%s489_s1 + $0x70] sm:$0xff] %vm144_vm0, %v46_v33 }
  0xbe   :  { %v111_v34 = vpop.trf.xlu1  ;;  %v47_v35 = vpop.trf.xlu0 }
  0xbf   :  { %192 = vst.msk [vmem:[%s489_s1 + $0x178] sm:$0xff] %vm144_vm0, %v111_v34  ;;  %160 = vst.msk [vmem:[%s489_s1 + $0x78] sm:$0xff] %vm144_vm0, %v47_v35 }
  0xc2   :  { %v128_v36 = vpop.trf.xlu1  ;;  %v64_v37 = vpop.trf.xlu0 }
  0xc3   :  { %193 = vst.msk [vmem:[%s489_s1 + $0x180] sm:$0xff] %vm144_vm0, %v128_v36  ;;  %161 = vst.msk [vmem:[%s489_s1 + $0x80] sm:$0xff] %vm144_vm0, %v64_v37 }
  0xc6   :  { %v129_v38 = vpop.trf.xlu1  ;;  %v65_v39 = vpop.trf.xlu0 }
  0xc7   :  { %194 = vst.msk [vmem:[%s489_s1 + $0x188] sm:$0xff] %vm144_vm0, %v129_v38  ;;  %162 = vst.msk [vmem:[%s489_s1 + $0x88] sm:$0xff] %vm144_vm0, %v65_v39 }
  0xca   :  { %v130_v40 = vpop.trf.xlu1  ;;  %v66_v41 = vpop.trf.xlu0 }
  0xcb   :  { %195 = vst.msk [vmem:[%s489_s1 + $0x190] sm:$0xff] %vm144_vm0, %v130_v40  ;;  %163 = vst.msk [vmem:[%s489_s1 + $0x90] sm:$0xff] %vm144_vm0, %v66_v41 }
  0xce   :  { %v131_v42 = vpop.trf.xlu1  ;;  %v67_v43 = vpop.trf.xlu0 }
  0xcf   :  { %196 = vst.msk [vmem:[%s489_s1 + $0x198] sm:$0xff] %vm144_vm0, %v131_v42  ;;  %164 = vst.msk [vmem:[%s489_s1 + $0x98] sm:$0xff] %vm144_vm0, %v67_v43 }
  0xd2   :  { %v132_v44 = vpop.trf.xlu1  ;;  %v68_v45 = vpop.trf.xlu0 }
  0xd3   :  { %197 = vst.msk [vmem:[%s489_s1 + $0x1a0] sm:$0xff] %vm144_vm0, %v132_v44  ;;  %165 = vst.msk [vmem:[%s489_s1 + $0xa0] sm:$0xff] %vm144_vm0, %v68_v45 }
  0xd6   :  { %v133_v46 = vpop.trf.xlu1  ;;  %v69_v47 = vpop.trf.xlu0 }
  0xd7   :  { %198 = vst.msk [vmem:[%s489_s1 + $0x1a8] sm:$0xff] %vm144_vm0, %v133_v46  ;;  %166 = vst.msk [vmem:[%s489_s1 + $0xa8] sm:$0xff] %vm144_vm0, %v69_v47 }
  0xda   :  { %v134_v48 = vpop.trf.xlu1  ;;  %v70_v49 = vpop.trf.xlu0 }
  0xdb   :  { %199 = vst.msk [vmem:[%s489_s1 + $0x1b0] sm:$0xff] %vm144_vm0, %v134_v48  ;;  %167 = vst.msk [vmem:[%s489_s1 + $0xb0] sm:$0xff] %vm144_vm0, %v70_v49 }
  0xde   :  { %v135_v50 = vpop.trf.xlu1  ;;  %v71_v51 = vpop.trf.xlu0 }
  0xdf   :  { %200 = vst.msk [vmem:[%s489_s1 + $0x1b8] sm:$0xff] %vm144_vm0, %v135_v50  ;;  %168 = vst.msk [vmem:[%s489_s1 + $0xb8] sm:$0xff] %vm144_vm0, %v71_v51 }
  0xe2   :  { %v136_v52 = vpop.trf.xlu1  ;;  %v72_v53 = vpop.trf.xlu0 }
  0xe3   :  { %201 = vst.msk [vmem:[%s489_s1 + $0x1c0] sm:$0xff] %vm144_vm0, %v136_v52  ;;  %169 = vst.msk [vmem:[%s489_s1 + $0xc0] sm:$0xff] %vm144_vm0, %v72_v53 }
  0xe6   :  { %v137_v54 = vpop.trf.xlu1  ;;  %v73_v55 = vpop.trf.xlu0 }
  0xe7   :  { %202 = vst.msk [vmem:[%s489_s1 + $0x1c8] sm:$0xff] %vm144_vm0, %v137_v54  ;;  %170 = vst.msk [vmem:[%s489_s1 + $0xc8] sm:$0xff] %vm144_vm0, %v73_v55 }
  0xea   :  { %v138_v56 = vpop.trf.xlu1  ;;  %v74_v57 = vpop.trf.xlu0 }
  0xeb   :  { %203 = vst.msk [vmem:[%s489_s1 + $0x1d0] sm:$0xff] %vm144_vm0, %v138_v56  ;;  %171 = vst.msk [vmem:[%s489_s1 + $0xd0] sm:$0xff] %vm144_vm0, %v74_v57 }
  0xee   :  { %v139_v58 = vpop.trf.xlu1  ;;  %v75_v59 = vpop.trf.xlu0 }
  0xef   :  { %204 = vst.msk [vmem:[%s489_s1 + $0x1d8] sm:$0xff] %vm144_vm0, %v139_v58  ;;  %172 = vst.msk [vmem:[%s489_s1 + $0xd8] sm:$0xff] %vm144_vm0, %v75_v59 }
  0xf2   :  { %v140_v60 = vpop.trf.xlu1  ;;  %v76_v61 = vpop.trf.xlu0 }
  0xf3   :  { %205 = vst.msk [vmem:[%s489_s1 + $0x1e0] sm:$0xff] %vm144_vm0, %v140_v60  ;;  %173 = vst.msk [vmem:[%s489_s1 + $0xe0] sm:$0xff] %vm144_vm0, %v76_v61 }
  0xf6   :  { %v141_v62 = vpop.trf.xlu1  ;;  %v77_v63 = vpop.trf.xlu0 }
  0xf7   :  { %206 = vst.msk [vmem:[%s489_s1 + $0x1e8] sm:$0xff] %vm144_vm0, %v141_v62  ;;  %174 = vst.msk [vmem:[%s489_s1 + $0xe8] sm:$0xff] %vm144_vm0, %v77_v63 }
  0xfa   :  { %v142_v0 = vpop.trf.xlu1  ;;  %v78_v1 = vpop.trf.xlu0 }
  0xfb   :  { %207 = vst.msk [vmem:[%s489_s1 + $0x1f0] sm:$0xff] %vm144_vm0, %v142_v0  ;;  %175 = vst.msk [vmem:[%s489_s1 + $0xf0] sm:$0xff] %vm144_vm0, %v78_v1 }
  0xfe   :  { %v143_v2 = vpop.trf.xlu1  ;;  %v79_v3 = vpop.trf.xlu0 }
  0xff   :  { %208 = vst.msk [vmem:[%s489_s1 + $0x1f8] sm:$0xff] %vm144_vm0, %v143_v2  ;;  %176 = vst.msk [vmem:[%s489_s1 + $0xf8] sm:$0xff] %vm144_vm0, %v79_v3 }

</bundles_post_ra>
